<compile_context>
chip_gen: v7x
topology: tpu7x:2x2x1
jax: 0.10.0
libtpu: 0.0.40
codegen_flags: <defaults>
</compile_context>

<pallas_src>
import functools

import jax
import jax.numpy as jnp
from jax.experimental import pallas as pl
from jax.experimental.pallas import tpu as pltpu


def _round_up(x: int, m: int) -> int:
    return (x + m - 1) // m * m


def _mlp_kernel(x_ref, w1t_ref, w2t_ref, *rest, drop_p: float):
    """One (TN, D) row tile: relu(x @ W1^T) @ W2^T, then inverted dropout."""
    if drop_p > 0.0:
        bits_ref, o_ref = rest
    else:
        (o_ref,) = rest

    x = x_ref[...]                                            # (TN, D) bf16
    h = jnp.dot(x, w1t_ref[...],
                preferred_element_type=jnp.float32)           # (TN, H) fp32
    h = jnp.maximum(h, 0.0)                                   # ReLU (fp32)
    y = jnp.dot(h.astype(jnp.bfloat16), w2t_ref[...],
                preferred_element_type=jnp.float32)           # (TN, D) fp32

    if drop_p > 0.0:
        # Inverted dropout (nn.Dropout training semantics): zero with prob p,
        # scale survivors by 1/(1-p).  uint32 bits vs uint32 threshold, so the
        # keep probability is exact (no signed-compare skew).
        # NOTE: p == 1.0 keeps a ~2^-32 sliver (threshold clips at 2^32 - 1);
        # scale is forced to 0 in that case so the output is still all-zero.
        threshold = jnp.uint32(min(int(drop_p * 4294967296.0), 4294967295))
        scale = (1.0 / (1.0 - drop_p)) if drop_p < 1.0 else 0.0
        keep = bits_ref[...] >= threshold
        y = jnp.where(keep, y * scale, 0.0)

    o_ref[...] = y.astype(o_ref.dtype)


def mlp_forward(x, w1, w2, *, dropout: float = 0.0, rng_key=None,
                row_tile: int = 256):
    """x: (..., dim). w1: (hidden, dim), w2: (dim, hidden) — torch nn.Linear
    weight layout (out_features, in_features).  RNG stream for dropout differs
    from torch's; the Bernoulli keep-mask + 1/(1-p) rescale semantics match."""
    orig_shape = x.shape
    dim = orig_shape[-1]
    hidden = w1.shape[0]
    assert w1.shape == (hidden, dim)
    assert w2.shape == (dim, hidden)

    x2d = x.reshape(-1, dim)                      # (N, dim)
    n = x2d.shape[0]

    # Padded / tiled sizes: lanes to 128, rows to a multiple of the row tile.
    dim_p = _round_up(dim, 128)
    hid_p = _round_up(hidden, 128)
    tn = min(row_tile, _round_up(n, 8))           # rows per grid step (mult of 8)
    n_p = _round_up(n, tn)
    grid = (n_p // tn,)

    # Wrapper-side glue: pad with zeros (exact for matmul/ReLU), cast matmul
    # inputs to bf16 (fp32 accumulation happens in-kernel), pre-transpose
    # weights so the kernel issues straight row-major MXU matmuls.
    x_p = jnp.pad(x2d.astype(jnp.bfloat16),
                  ((0, n_p - n), (0, dim_p - dim)))
    w1t = jnp.pad(jnp.transpose(w1).astype(jnp.bfloat16),
                  ((0, dim_p - dim), (0, hid_p - hidden)))     # (D, H)
    w2t = jnp.pad(jnp.transpose(w2).astype(jnp.bfloat16),
                  ((0, hid_p - hidden), (0, dim_p - dim)))     # (H, D)

    in_specs = [
        pl.BlockSpec((tn, dim_p), lambda i: (i, 0)),           # x: row tiles
        pl.BlockSpec((dim_p, hid_p), lambda i: (0, 0)),        # W1^T: resident
        pl.BlockSpec((hid_p, dim_p), lambda i: (0, 0)),        # W2^T: resident
    ]
    operands = [x_p, w1t, w2t]

    drop_p = float(dropout)
    if drop_p > 0.0:
        if rng_key is None:
            rng_key = jax.random.PRNGKey(0)
        bits = jax.random.bits(rng_key, (n_p, dim_p), dtype=jnp.uint32)
        in_specs.append(pl.BlockSpec((tn, dim_p), lambda i: (i, 0)))
        operands.append(bits)

    out_p = pl.pallas_call(
        functools.partial(_mlp_kernel, drop_p=drop_p),
        out_shape=jax.ShapeDtypeStruct((n_p, dim_p), x.dtype),
        grid_spec=pltpu.PrefetchScalarGridSpec(
            num_scalar_prefetch=0,
            grid=grid,
            in_specs=in_specs,
            out_specs=pl.BlockSpec((tn, dim_p), lambda i: (i, 0)),
        ),
        compiler_params=pltpu.CompilerParams(
            dimension_semantics=("parallel",)),
    )(*operands)

    return out_p[:n, :dim].reshape(orig_shape)


if __name__ == "__main__":
    # Small shapes consistent with the module: (batch, seq, dim), MLP dim->hidden.
    batch, seq, dim, hidden = 2, 8, 32, 64
    dropout_p = 0.1

    key = jax.random.PRNGKey(0)
    kx, kw1, kw2, kdrop = jax.random.split(key, 4)
    x = jax.random.normal(kx, (batch, seq, dim), dtype=jnp.float32)
    # Deterministic synthetic parameters (torch Linear weight shapes).
    w1 = jax.random.normal(kw1, (hidden, dim), dtype=jnp.float32) * 0.1
    w2 = jax.random.normal(kw2, (dim, hidden), dtype=jnp.float32) * 0.1

    # Training-mode path with dropout enabled.
    y = mlp_forward(x, w1, w2, dropout=dropout_p, rng_key=kdrop)
    jax.block_until_ready(y)
    assert y.shape == x.shape

    # Deterministic path (dropout disabled) vs pure-JAX fp32 reference.
    # Kernel matmul inputs are bf16 (fp32 accumulate), so use a loose tolerance.
    y_nodrop = mlp_forward(x, w1, w2, dropout=0.0)
    jax.block_until_ready(y_nodrop)
    ref = jnp.maximum(x @ w1.T, 0.0) @ w2.T
    assert jnp.allclose(y_nodrop, ref, atol=3e-2, rtol=3e-2), (
        float(jnp.max(jnp.abs(y_nodrop - ref))))

    print("KERNEL_OK")
</pallas_src>

<mosaic_0001>
module attributes {stable_mosaic.version = 11 : i64} {
  func.func @_mlp_kernel(%arg0: i32, %arg1: memref<16x128xbf16, #tpu.memory_space<vmem>>, %arg2: memref<128x128xbf16, #tpu.memory_space<vmem>>, %arg3: memref<128x128xbf16, #tpu.memory_space<vmem>>, %arg4: memref<16x128xi32, #tpu.memory_space<vmem>>, %arg5: memref<16x128xf32, #tpu.memory_space<vmem>>) attributes {dimension_semantics = [#tpu.dimension_semantics<parallel>], iteration_bounds = array<i64: 1>, scalar_prefetch = 0 : i64, scratch_operands = 0 : i64, tpu.core_type = #tpu.core_type<tc>, window_params = [{transform_indices = @transform_0, window_bounds = array<i64: 16, 128>}, {pipeline_mode = #tpu.pipeline_mode<synchronous>, transform_indices = @transform_1, window_bounds = array<i64: 128, 128>}, {pipeline_mode = #tpu.pipeline_mode<synchronous>, transform_indices = @transform_2, window_bounds = array<i64: 128, 128>}, {transform_indices = @transform_3, window_bounds = array<i64: 16, 128>}, {transform_indices = @transform_4, window_bounds = array<i64: 16, 128>}]} {
    %c0 = arith.constant 0 : index
    %c0_0 = arith.constant 0 : index
    %0 = vector.load %arg1[%c0, %c0_0] : memref<16x128xbf16, #tpu.memory_space<vmem>>, vector<16x128xbf16>
    %c0_1 = arith.constant 0 : index
    %c0_2 = arith.constant 0 : index
    %1 = vector.load %arg2[%c0_1, %c0_2] : memref<128x128xbf16, #tpu.memory_space<vmem>>, vector<128x128xbf16>
    %cst = arith.constant dense<0.000000e+00> : vector<16x128xf32>
    %2 = tpu.matmul %0, %1, %cst {dimension_numbers = #tpu.dot_dimension_numbers<[1], [0], [0], [1], [0, 0, 1, 1], [], []>} : vector<16x128xbf16>, vector<128x128xbf16>, vector<16x128xf32> -> vector<16x128xf32>
    %cst_3 = arith.constant 0.000000e+00 : f32
    %3 = vector.broadcast %cst_3 : f32 to vector<16x128xf32>
    %4 = arith.maximumf %2, %3 : vector<16x128xf32>
    %5 = arith.truncf %4 : vector<16x128xf32> to vector<16x128xbf16>
    %c0_4 = arith.constant 0 : index
    %c0_5 = arith.constant 0 : index
    %6 = vector.load %arg3[%c0_4, %c0_5] : memref<128x128xbf16, #tpu.memory_space<vmem>>, vector<128x128xbf16>
    %cst_6 = arith.constant dense<0.000000e+00> : vector<16x128xf32>
    %7 = tpu.matmul %5, %6, %cst_6 {dimension_numbers = #tpu.dot_dimension_numbers<[1], [0], [0], [1], [0, 0, 1, 1], [], []>} : vector<16x128xbf16>, vector<128x128xbf16>, vector<16x128xf32> -> vector<16x128xf32>
    %c0_7 = arith.constant 0 : index
    %c0_8 = arith.constant 0 : index
    %8 = vector.load %arg4[%c0_7, %c0_8] : memref<16x128xi32, #tpu.memory_space<vmem>>, vector<16x128xi32>
    %c429496729_i32 = arith.constant 429496729 : i32
    %9 = vector.broadcast %c429496729_i32 : i32 to vector<16x128xi32>
    %10 = arith.cmpi uge, %8, %9 : vector<16x128xi32>
    %cst_9 = arith.constant 1.11111116 : f32
    %11 = vector.broadcast %cst_9 : f32 to vector<16x128xf32>
    %12 = arith.mulf %7, %11 : vector<16x128xf32>
    %cst_10 = arith.constant 0.000000e+00 : f32
    %13 = vector.broadcast %cst_10 : f32 to vector<16x128xf32>
    %14 = arith.select %10, %12, %13 : vector<16x128xi1>, vector<16x128xf32>
    %c0_11 = arith.constant 0 : index
    %c0_12 = arith.constant 0 : index
    %15 = vector.load %arg5[%c0_11, %c0_12] : memref<16x128xf32, #tpu.memory_space<vmem>>, vector<16x128xf32>
    tpu.vector_store %arg5[%c0_11, %c0_12], %14 {strides = array<i32>} : memref<16x128xf32, #tpu.memory_space<vmem>>, vector<16x128xf32>,
    return
  }
  func.func @transform_0(%arg0: i32) -> (i32, i32) {
    %c0_i32 = arith.constant 0 : i32
    %c0_i32_0 = arith.constant 0 : i32
    return %arg0, %c0_i32 : i32, i32
  }
  func.func @transform_1(%arg0: i32) -> (i32, i32) {
    %c0_i32 = arith.constant 0 : i32
    %c0_i32_0 = arith.constant 0 : i32
    %c0_i32_1 = arith.constant 0 : i32
    return %c0_i32, %c0_i32_0 : i32, i32
  }
  func.func @transform_2(%arg0: i32) -> (i32, i32) {
    %c0_i32 = arith.constant 0 : i32
    %c0_i32_0 = arith.constant 0 : i32
    %c0_i32_1 = arith.constant 0 : i32
    return %c0_i32, %c0_i32_0 : i32, i32
  }
  func.func @transform_3(%arg0: i32) -> (i32, i32) {
    %c0_i32 = arith.constant 0 : i32
    %c0_i32_0 = arith.constant 0 : i32
    return %arg0, %c0_i32 : i32, i32
  }
  func.func @transform_4(%arg0: i32) -> (i32, i32) {
    %c0_i32 = arith.constant 0 : i32
    %c0_i32_0 = arith.constant 0 : i32
    return %arg0, %c0_i32 : i32, i32
  }
}

</mosaic_0001>

<bundles_post_ra>
// kernel: tpu_custom_call.1
= control target key start
LH: loop header
LB: loop body
LE: loop exit
PB: predicated region body
PF: predicated region fallthrough
CT: control target
= control target key end

     0   :  { %9 = vsyncpa [#allocation3], 0  ;;  %s670_s0 = inlined_call_operand.hbm [shape: bf16[16,128], index: 0, kind: input, shape index: {}]   ;;  %s671_s1 = inlined_call_operand.hbm [shape: bf16[128,128], index: 1, kind: input, shape index: {}]   ;;  %s672_s2 = inlined_call_operand.hbm [shape: bf16[128,128], index: 2, kind: input, shape index: {}]   ;;  %s673_s3 = inlined_call_operand.hbm [shape: u32[16,128], index: 3, kind: input, shape index: {}]   ;;  %s674_s4 = inlined_call_operand.hbm [shape: f32[16,128], index: 4, kind: output, shape index: {}]  }
   0x1   :  { %10 = vsyncpa [#allocation6], 0 }
   0x2   :  { %11 = vsyncpa [#allocation9], 0 }
   0x3   :  { %12 = vsyncpa [#allocation4], 0  ;;  %s545_s15 = smov [#allocation5]   ;;  %s546_s17 = smov [#allocation2]  }
   0x4   :  { %s30_s16 = sshll.u32 %s545_s15, 4  ;;  %s18_s18 = sshll.u32 %s546_s17, 4  ;;  %s31_s16 = int_to_ptr.vmem [resolvable:$true] %s30_s16  ;;  %s581_s18 = int_to_ptr.vmem [resolvable:$true] %s18_s18 }
   0x5   :  { %s427_s21 = scalar_lea.hbm %s671_s1, 1024 }
   0x6   :  { %p428_p0 = scmp.ne.s32.totalorder %s671_s1, %s427_s21  ;;  %p431_p1 = scmp.lt.u32.totalorder %s427_s21, %s671_s1 }
   0x8   :  { %p433_p2 = pnand %p431_p1, %p428_p0 }
   0xa   :  { %436 = shalt.err (!%p433_p2)
}
   0xb   :  { %s437_s26 = scalar_lea.vmem %s31_s16, 1024  ;;  %p442_p4 = scmp.lt.s32.totalorder %s31_s16, %s31_s16 }
   0xc   :  { %p438_p3 = scmp.ne.s32.totalorder %s31_s16, %s437_s26  ;;  %p443_p5 = scmp.lt.s32.totalorder %s437_s26, %s437_s26 }
   0xe   :  { %p444_p6 = por %p443_p5, %p442_p4 }
  0x10   :  { %p445_p7 = pnand %p444_p6, %p438_p3 }
  0x12   :  { %448 = shalt.err (!%p445_p7)
}
  0x13   :  { %s547_s27 = smov 64   ;;  %s548_s28 = smov 4  }
  0x14   :  { %36 = dma.hbm_to_vmem [thread:$0]  %s671_s1, 1024, %s31_s16, [#allocation6], %s547_s27, %s547_s27, %s548_s28  }
  0x15   :  { %s449_s7 = scalar_lea.hbm %s670_s0, 128 }
  0x16   :  { %p450_p8 = scmp.ne.s32.totalorder %s670_s0, %s449_s7  ;;  %p453_p9 = scmp.lt.u32.totalorder %s449_s7, %s670_s0 }
  0x18   :  { %p455_p10 = pnand %p453_p9, %p450_p8 }
  0x1a   :  { %458 = shalt.err (!%p455_p10)
}
  0x1b   :  { %s459_s12 = scalar_lea.vmem %s581_s18, 128  ;;  %p464_p12 = scmp.lt.s32.totalorder %s581_s18, %s581_s18 }
  0x1c   :  { %p460_p11 = scmp.ne.s32.totalorder %s581_s18, %s459_s12  ;;  %p465_p13 = scmp.lt.s32.totalorder %s459_s12, %s459_s12 }
  0x1e   :  { %p466_p0 = por %p465_p13, %p464_p12 }
  0x20   :  { %p467_p1 = pnand %p466_p0, %p460_p11 }
  0x22   :  { %470 = shalt.err (!%p467_p1)
}
  0x23   :  { %24 = dma.hbm_to_vmem [thread:$0]  %s670_s0, 128, %s581_s18, [#allocation3], %s547_s27, %s547_s27, %s548_s28  }
  0x24   :  { %s549_s14 = smov [#allocation7]   ;;  %s550_s16 = smov [#allocation8]  }
  0x25   :  { %s42_s15 = sshll.u32 %s549_s14, 4  ;;  %s54_s17 = sshll.u32 %s550_s16, 4  ;;  %s43_s15 = int_to_ptr.vmem [resolvable:$true] %s42_s15  ;;  %s618_s17 = int_to_ptr.vmem [resolvable:$true] %s54_s17 }
  0x26   :  { %s471_s21 = scalar_lea.hbm %s672_s2, 1024 }
  0x27   :  { %p472_p2 = scmp.ne.s32.totalorder %s672_s2, %s471_s21  ;;  %p475_p3 = scmp.lt.u32.totalorder %s471_s21, %s672_s2 }
  0x29   :  { %p477_p4 = pnand %p475_p3, %p472_p2 }
  0x2b   :  { %480 = shalt.err (!%p477_p4)
}
  0x2c   :  { %s481_s0 = scalar_lea.vmem %s43_s15, 1024  ;;  %p486_p6 = scmp.lt.s32.totalorder %s43_s15, %s43_s15 }
  0x2d   :  { %p482_p5 = scmp.ne.s32.totalorder %s43_s15, %s481_s0  ;;  %p487_p7 = scmp.lt.s32.totalorder %s481_s0, %s481_s0 }
  0x2f   :  { %p488_p8 = por %p487_p7, %p486_p6 }
  0x31   :  { %p489_p9 = pnand %p488_p8, %p482_p5 }
  0x33   :  { %492 = shalt.err (!%p489_p9)
}
  0x34   :  { %48 = dma.hbm_to_vmem [thread:$0]  %s672_s2, 1024, %s43_s15, [#allocation6], %s547_s27, %s547_s27, %s548_s28  }
  0x35   :  { %s493_s5 = scalar_lea.hbm %s673_s3, 256 }
  0x36   :  { %p494_p10 = scmp.ne.s32.totalorder %s673_s3, %s493_s5  ;;  %p497_p11 = scmp.lt.u32.totalorder %s493_s5, %s673_s3 }
  0x38   :  { %p499_p12 = pnand %p497_p11, %p494_p10 }
  0x3a   :  { %502 = shalt.err (!%p499_p12)
}
  0x3b   :  { %s503_s10 = scalar_lea.vmem %s618_s17, 256  ;;  %p508_p0 = scmp.lt.s32.totalorder %s618_s17, %s618_s17 }
  0x3c   :  { %p504_p13 = scmp.ne.s32.totalorder %s618_s17, %s503_s10  ;;  %p509_p1 = scmp.lt.s32.totalorder %s503_s10, %s503_s10 }
  0x3e   :  { %p510_p2 = por %p509_p1, %p508_p0 }
  0x40   :  { %p511_p3 = pnand %p510_p2, %p504_p13 }
  0x42   :  { %514 = shalt.err (!%p511_p3)
}
  0x43   :  { %s551_s2 = smov 128   ;;  %s552_s27 = smov 8  }
  0x44   :  { %60 = dma.hbm_to_vmem [thread:$0]  %s673_s3, 256, %s618_s17, [#allocation9], %s551_s2, %s551_s2, %s552_s27  }
  0x45   :  { %537 = dma.done.wait [#allocation3], 128  }
  0x46   :  { %538 = vsyncadd [#allocation3], 4294967168 }
  0x47   :  { %539 = dma.done.wait [#allocation6], 2048  }
  0x48   :  { %540 = vsyncadd [#allocation6], 4294965248 }
  0x49   :  { %541 = dma.done.wait [#allocation9], 256  }
  0x4a   :  { %542 = vsyncadd [#allocation9], 4294967040  ;;  %v553_v0 = vmov 0.0   ;;  %vm554_vm0 = vmmov 0   ;;  %v410_v1 = vld [vmem:[#allocation5] sm:$0xff]   ;;  %v411_v2 = vld [vmem:[#allocation5 + $0x8] sm:$0xff]  }
  0x4b   :  { %359 = vmatprep.subr.bf16.mxu0 %v553_v0  ;;  %375 = vmatprep.mubr.msk.bf16.mxu0 %vm554_vm0, %v553_v0  ;;  %v412_v3 = vld [vmem:[#allocation5 + $0x10] sm:$0xff]   ;;  %v419_v4 = vld [vmem:[#allocation7] sm:$0xff]   ;;  %v413_v5 = vld [vmem:[#allocation5 + $0x18] sm:$0xff]   ;;  %s555_s3 = smov [#allocation10]  }
  0x4c   :  { %379 = vmatprep.subr.bf16.mxu1 %v553_v0  ;;  %395 = vmatprep.mubr.msk.bf16.mxu1 %vm554_vm0, %v553_v0  ;;  %v420_v6 = vld [vmem:[#allocation7 + $0x8] sm:$0xff]   ;;  %v414_v7 = vld [vmem:[#allocation5 + $0x20] sm:$0xff]   ;;  %v421_v8 = vld [vmem:[#allocation7 + $0x10] sm:$0xff]   ;;  %s310_s12 = sshll.u32 %s555_s3, 4  ;;  %s311_s12 = int_to_ptr.vmem [resolvable:$true] %s310_s12 }
  0x4d   :  { %360 = vmatpush3.bf16.msra.mxu0 %v410_v1  ;;  %380 = vmatpush3.bf16.msra.mxu1 %v419_v4  ;;  %v415_v9 = vld [vmem:[#allocation5 + $0x28] sm:$0xff]   ;;  %v422_v10 = vld [vmem:[#allocation7 + $0x18] sm:$0xff]   ;;  %v416_v11 = vld [vmem:[#allocation5 + $0x30] sm:$0xff]   ;;  %s515_s1 = scalar_lea.vmem %s311_s12, 256  ;;  %p520_p5 = scmp.lt.s32.totalorder %s311_s12, %s311_s12 }
  0x4e   :  { %361 = vmatprep.subr.bf16.mxu0 %v553_v0  ;;  %381 = vmatprep.subr.bf16.mxu1 %v553_v0  ;;  %v423_v12 = vld [vmem:[#allocation7 + $0x20] sm:$0xff]   ;;  %v417_v13 = vld [vmem:[#allocation5 + $0x38] sm:$0xff]   ;;  %v424_v14 = vld [vmem:[#allocation7 + $0x28] sm:$0xff]   ;;  %p516_p4 = scmp.ne.s32.totalorder %s311_s12, %s515_s1  ;;  %p521_p6 = scmp.lt.s32.totalorder %s515_s1, %s515_s1 }
  0x4f   :  { %v418_v15 = vld [vmem:[#allocation2] sm:$0xff]   ;;  %v425_v16 = vld [vmem:[#allocation7 + $0x30] sm:$0xff]   ;;  %v295_v25 = vld [vmem:[#allocation8] sm:$0xff] }
  0x50   :  { %v426_v17 = vld [vmem:[#allocation7 + $0x38] sm:$0xff]   ;;  %v296_v26 = vld [vmem:[#allocation8 + $0x8] sm:$0xff]  ;;  %vm297_vm1 = vcmp.ge.u32.totalorder %v295_v25, 429496729  ;;  %p522_p7 = por %p521_p6, %p520_p5 }
  0x51   :  { %362 = vmatpush3.bf16.msra.mxu0 %v411_v2  ;;  %382 = vmatpush3.bf16.msra.mxu1 %v420_v6  ;;  %vm298_vm2 = vcmp.ge.u32.totalorder %v296_v26, 429496729 }
  0x52   :  { %363 = vmatprep.subr.bf16.mxu0 %v553_v0  ;;  %383 = vmatprep.subr.bf16.mxu1 %v553_v0  ;;  %p523_p8 = pnand %p522_p7, %p516_p4 }
  0x55   :  { %364 = vmatpush3.bf16.msra.mxu0 %v412_v3  ;;  %384 = vmatpush3.bf16.msra.mxu1 %v421_v8 }
  0x56   :  { %365 = vmatprep.subr.bf16.mxu0 %v553_v0  ;;  %385 = vmatprep.subr.bf16.mxu1 %v553_v0 }
  0x59   :  { %366 = vmatpush3.bf16.msra.mxu0 %v413_v5  ;;  %386 = vmatpush3.bf16.msra.mxu1 %v422_v10 }
  0x5a   :  { %367 = vmatprep.subr.bf16.mxu0 %v553_v0  ;;  %387 = vmatprep.subr.bf16.mxu1 %v553_v0 }
  0x5d   :  { %368 = vmatpush3.bf16.msra.mxu0 %v414_v7  ;;  %388 = vmatpush3.bf16.msra.mxu1 %v423_v12 }
  0x5e   :  { %369 = vmatprep.subr.bf16.mxu0 %v553_v0  ;;  %389 = vmatprep.subr.bf16.mxu1 %v553_v0 }
  0x61   :  { %370 = vmatpush3.bf16.msra.mxu0 %v415_v9  ;;  %390 = vmatpush3.bf16.msra.mxu1 %v424_v14 }
  0x62   :  { %371 = vmatprep.subr.bf16.mxu0 %v553_v0  ;;  %391 = vmatprep.subr.bf16.mxu1 %v553_v0 }
  0x65   :  { %372 = vmatpush3.bf16.msra.mxu0 %v416_v11  ;;  %392 = vmatpush3.bf16.msra.mxu1 %v425_v16 }
  0x66   :  { %373 = vmatprep.subr.bf16.mxu0 %v553_v0  ;;  %393 = vmatprep.subr.bf16.mxu1 %v553_v0 }
  0x69   :  { %374 = vmatpush3.bf16.msra.mxu0 %v417_v13  ;;  %394 = vmatpush3.bf16.msra.mxu1 %v426_v17 }
  0x6c   :  { %376 = vmatmul.mubr.bf16.vlgmr.msra.gmra.mrb[0].mxu0 %v418_v15 }
 0x13f   :  { %v180_v18 = vpop.f32.mrb[0].mxu0 }
 0x140   :  { %v377_v19 = vpop.f32.mrb[1].mxu0  ;;  %v187_v21 = vmax.f32 %v180_v18, 0.0 }
 0x141   :  { %v183_v20 = vpop.f32.mrb[2].mxu0 }
 0x142   :  { %v188_v22 = vmax.f32 %v183_v20, 0.0  ;;  %v378_v23 = vpop.f32.mrb[3].mxu0 }
 0x144   :  { %v189_v24 = vpack.c.bf16 %v188_v22, %v187_v21 }
 0x146   :  { %396 = vmatmul.mubr.bf16.vlgmr.msra.gmra.mrb[0].mxu1 %v189_v24 }
 0x219   :  { %v288_v27 = vpop.f32.mrb[0].mxu1 }
 0x21a   :  { %v299_v28 = vmul.f32 1.1111112, %v288_v27  ;;  %v397_v29 = vpop.f32.mrb[1].mxu1 }
 0x21b   :  { %v291_v30 = vpop.f32.mrb[2].mxu1 }
 0x21c   :  { %v301_v31 = vsel %vm297_vm1, %v299_v28, 0.0  ;;  %v300_v32 = vmul.f32 1.1111112, %v291_v30  ;;  %v398_v33 = vpop.f32.mrb[3].mxu1 }
 0x21d   :  { %303 = vst [vmem:[#allocation10] sm:$0xff] %v301_v31 }
 0x21e   :  { %v302_v34 = vsel %vm298_vm2, %v300_v32, 0.0 }
 0x21f   :  { %304 = vst [vmem:[#allocation10 + $0x8] sm:$0xff] %v302_v34 }
 0x220   :  { %526 = shalt.err (!%p523_p8)
}
 0x221   :  { %s527_s15 = scalar_lea.hbm %s674_s4, 256 }
 0x222   :  { %p528_p9 = scmp.ne.s32.totalorder %s674_s4, %s527_s15  ;;  %p531_p10 = scmp.lt.u32.totalorder %s527_s15, %s674_s4 }
 0x224   :  { %p533_p11 = pnand %p531_p10, %p528_p9 }
 0x226   :  { %536 = shalt.err (!%p533_p11)
}
 0x227   :  { %316 = dma.vmem_to_hbm [thread:$0]  %s311_s12, 256, %s674_s4, [#allocation4], %s551_s2, %s551_s2, %s552_s27  }
 0x228   :  { %543 = dma.done.wait [#allocation4], 256  }
 0x229   :  { %544 = vsyncadd [#allocation4], 4294967040 }
 0x22a   :  { %320 = vsyncpa [#allocation3], 1 }
 0x22b   :  { %321 = vsyncpa [#allocation6], 1 }
 0x22c   :  { %322 = vsyncpa [#allocation9], 1 }
 0x22d   :  { %323 = vsyncpa [#allocation4], 1 }

</bundles_post_ra>
